<compile_context>
chip_gen: v7x
topology: tpu7x:2x2x1
jax: 0.10.0
libtpu: 0.0.40
codegen_flags: <defaults>
</compile_context>

<pallas_src>
import functools

import jax
import jax.numpy as jnp
from jax.experimental import pallas as pl
from jax.experimental.pallas import tpu as pltpu


_SMALL_C_MAX = 16                         # <= this: VPU weighted sum, else MXU
_TARGET_BLOCK_BYTES = 2 * 1024 * 1024     # ~2 MiB per (C, TILE_HW) block


def _choose_tile_hw(C, HW, itemsize):
    """Lane-dense spatial tile: multiple of 128, ~_TARGET_BLOCK_BYTES per block."""
    hw128 = pl.cdiv(HW, 128) * 128
    t = _TARGET_BLOCK_BYTES // max(1, C * itemsize)
    t = max(128, min(t, hw128))
    t = (t // 128) * 128
    return t


def _small_c_kernel(C, w_ref, x_ref, o_ref):
    # w_ref: SMEM (C,) f32;  x_ref/o_ref: VMEM (1, C, TILE_HW) in input dtype.
    x = x_ref[0]                                            # (C, T)
    z = w_ref[0] * x[0:1, :].astype(jnp.float32)            # (1, T) f32
    for c in range(1, C):                                   # unrolled VPU sum
        z = z + w_ref[c] * x[c:c + 1, :].astype(jnp.float32)
    s = jax.nn.sigmoid(z)                                   # EUP, f32
    o_ref[0] = x * s.astype(x.dtype)                        # broadcast over C


def _mxu_kernel(w_ref, x_ref, o_ref):
    # w_ref: VMEM (1, C) in input dtype;  x_ref/o_ref: (1, C, TILE_HW).
    x = x_ref[0]                                            # (C, T)
    z = jnp.dot(w_ref[...], x, preferred_element_type=jnp.float32)  # (1, T) f32
    s = jax.nn.sigmoid(z)
    o_ref[0] = x * s.astype(x.dtype)


def spatial_attention_2d(x_nchw, weight):
    """x_nchw: (N, C, H, W); weight: (1, C, 1, 1) conv kernel (bias=False)."""
    N, C, H, W = x_nchw.shape
    HW = H * W
    itemsize = jnp.dtype(x_nchw.dtype).itemsize

    tile_hw = _choose_tile_hw(C, HW, itemsize)
    hw_pad = pl.cdiv(HW, tile_hw) * tile_hw
    num_hw_tiles = hw_pad // tile_hw

    x_flat = x_nchw.reshape(N, C, HW)
    if hw_pad != HW:
        x_flat = jnp.pad(x_flat, ((0, 0), (0, 0), (0, hw_pad - HW)))

    if C <= _SMALL_C_MAX:
        kernel = functools.partial(_small_c_kernel, C)
        w_arg = weight.reshape(C).astype(jnp.float32)                 # SMEM scalars
        w_spec = pl.BlockSpec(memory_space=pltpu.MemorySpace.SMEM)
    else:
        kernel = _mxu_kernel
        w_arg = weight.reshape(1, C).astype(x_nchw.dtype)             # MXU operand
        w_spec = pl.BlockSpec((1, C), lambda n, s: (0, 0))            # resident

    cost = pl.CostEstimate(
        flops=3 * N * C * HW,                 # conv MAC + gating multiply
        transcendentals=N * HW,               # sigmoid
        bytes_accessed=2 * N * C * HW * itemsize + C * 4,
    )

    out_flat = pl.pallas_call(
        kernel,
        out_shape=jax.ShapeDtypeStruct((N, C, hw_pad), x_nchw.dtype),
        grid_spec=pltpu.PrefetchScalarGridSpec(
            num_scalar_prefetch=0,
            grid=(N, num_hw_tiles),
            in_specs=[
                w_spec,
                pl.BlockSpec((1, C, tile_hw), lambda n, s: (n, 0, s)),
            ],
            out_specs=pl.BlockSpec((1, C, tile_hw), lambda n, s: (n, 0, s)),
        ),
        compiler_params=pltpu.CompilerParams(
            dimension_semantics=("parallel", "parallel")),
        cost_estimate=cost,
    )(w_arg, x_flat)

    if hw_pad != HW:
        out_flat = out_flat[:, :, :HW]
    return out_flat.reshape(N, C, H, W)


def reference(x_nchw, weight):
    # Pure-JAX reference matching the PyTorch module semantics.
    z = jnp.einsum("nchw,oc->nohw", x_nchw, weight.reshape(1, -1))
    z = jax.nn.sigmoid(z)
    return x_nchw * z


if __name__ == "__main__":
    key = jax.random.PRNGKey(0)
    kx, kw = jax.random.split(key)

    N, C, H, W = 2, 4, 16, 16
    x = jax.random.normal(kx, (N, C, H, W), dtype=jnp.float32)
    # Deterministic init of Conv2d(channel, 1, kernel_size=1, bias=False) weight.
    bound = 1.0 / (C ** 0.5)
    weight = jax.random.uniform(kw, (1, C, 1, 1), dtype=jnp.float32,
                                minval=-bound, maxval=bound)

    out = spatial_attention_2d(x, weight)
    out = jax.block_until_ready(out)

    ref = reference(x, weight)
    assert out.shape == (N, C, H, W)
    assert jnp.allclose(out, ref, atol=1e-5, rtol=1e-5)

    print("KERNEL_OK")
</pallas_src>

<mosaic_0001>
module attributes {stable_mosaic.version = 11 : i64} {
  func.func @_small_c_kernel(%arg0: i32, %arg1: i32, %arg2: memref<4xf32, #tpu.memory_space<smem>>, %arg3: memref<1x4x256xf32, #tpu.memory_space<vmem>>, %arg4: memref<1x4x256xf32, #tpu.memory_space<vmem>>) attributes {dimension_semantics = [#tpu.dimension_semantics<parallel>, #tpu.dimension_semantics<parallel>], iteration_bounds = array<i64: 2, 1>, scalar_prefetch = 0 : i64, scratch_operands = 0 : i64, tpu.core_type = #tpu.core_type<tc>, window_params = [{transform_indices = @transform_0, window_bounds = array<i64: 4>}, {transform_indices = @transform_1, window_bounds = array<i64: 1, 4, 256>}, {transform_indices = @transform_2, window_bounds = array<i64: 1, 4, 256>}]} {
    %c0 = arith.constant 0 : index
    %c0_0 = arith.constant 0 : index
    %c0_1 = arith.constant 0 : index
    %0 = vector.load %arg3[%c0, %c0_0, %c0_1] : memref<1x4x256xf32, #tpu.memory_space<vmem>>, vector<1x4x256xf32>
    %1 = vector.shape_cast %0 : vector<1x4x256xf32> to vector<4x256xf32>
    %c0_2 = arith.constant 0 : index
    %2 = memref.load %arg2[%c0_2] : memref<4xf32, #tpu.memory_space<smem>>
    %3 = vector.extract_strided_slice %1 {offsets = [0, 0], sizes = [1, 256], strides = [1, 1]} : vector<4x256xf32> to vector<1x256xf32>
    %4 = vector.broadcast %2 : f32 to vector<1x256xf32>
    %5 = arith.mulf %4, %3 : vector<1x256xf32>
    %c1 = arith.constant 1 : index
    %6 = memref.load %arg2[%c1] : memref<4xf32, #tpu.memory_space<smem>>
    %7 = vector.extract_strided_slice %1 {offsets = [1, 0], sizes = [1, 256], strides = [1, 1]} : vector<4x256xf32> to vector<1x256xf32>
    %8 = vector.broadcast %6 : f32 to vector<1x256xf32>
    %9 = arith.mulf %8, %7 : vector<1x256xf32>
    %10 = arith.addf %5, %9 : vector<1x256xf32>
    %c2 = arith.constant 2 : index
    %11 = memref.load %arg2[%c2] : memref<4xf32, #tpu.memory_space<smem>>
    %12 = vector.extract_strided_slice %1 {offsets = [2, 0], sizes = [1, 256], strides = [1, 1]} : vector<4x256xf32> to vector<1x256xf32>
    %13 = vector.broadcast %11 : f32 to vector<1x256xf32>
    %14 = arith.mulf %13, %12 : vector<1x256xf32>
    %15 = arith.addf %10, %14 : vector<1x256xf32>
    %c3 = arith.constant 3 : index
    %16 = memref.load %arg2[%c3] : memref<4xf32, #tpu.memory_space<smem>>
    %17 = vector.extract_strided_slice %1 {offsets = [3, 0], sizes = [1, 256], strides = [1, 1]} : vector<4x256xf32> to vector<1x256xf32>
    %18 = vector.broadcast %16 : f32 to vector<1x256xf32>
    %19 = arith.mulf %18, %17 : vector<1x256xf32>
    %20 = arith.addf %15, %19 : vector<1x256xf32>
    %21 = arith.negf %20 : vector<1x256xf32>
    %22 = math.exp %21 : vector<1x256xf32>
    %cst = arith.constant 1.000000e+00 : f32
    %23 = vector.broadcast %cst : f32 to vector<1x256xf32>
    %24 = arith.addf %23, %22 : vector<1x256xf32>
    %25 = arith.divf %23, %24 : vector<1x256xf32>
    %26 = vector.broadcast %25 : vector<1x256xf32> to vector<4x256xf32>
    %27 = arith.mulf %1, %26 : vector<4x256xf32>
    %c0_3 = arith.constant 0 : index
    %c0_4 = arith.constant 0 : index
    %c0_5 = arith.constant 0 : index
    %28 = vector.load %arg4[%c0_3, %c0_4, %c0_5] : memref<1x4x256xf32, #tpu.memory_space<vmem>>, vector<1x4x256xf32>
    %29 = vector.shape_cast %28 : vector<1x4x256xf32> to vector<4x256xf32>
    %30 = vector.shape_cast %27 : vector<4x256xf32> to vector<1x4x256xf32>
    tpu.vector_store %arg4[%c0_3, %c0_4, %c0_5], %30 {strides = array<i32>} : memref<1x4x256xf32, #tpu.memory_space<vmem>>, vector<1x4x256xf32>,
    return
  }
  func.func @transform_0(%arg0: i32, %arg1: i32) -> i32 {
    %c0_i32 = arith.constant 0 : i32
    %c0_i32_0 = arith.constant 0 : i32
    return %c0_i32 : i32
  }
  func.func @transform_1(%arg0: i32, %arg1: i32) -> (i32, i32, i32) {
    %c0_i32 = arith.constant 0 : i32
    %c0_i32_0 = arith.constant 0 : i32
    return %arg0, %c0_i32, %arg1 : i32, i32, i32
  }
  func.func @transform_2(%arg0: i32, %arg1: i32) -> (i32, i32, i32) {
    %c0_i32 = arith.constant 0 : i32
    %c0_i32_0 = arith.constant 0 : i32
    return %arg0, %c0_i32, %arg1 : i32, i32, i32
  }
}

</mosaic_0001>

<bundles_post_ra>
// kernel: tpu_custom_call.1
= control target key start
LH: loop header
LB: loop body
LE: loop exit
PB: predicated region body
PF: predicated region fallthrough
CT: control target
= control target key end

     0   :  { %7 = vsyncpa [#allocation5], 0  ;;  %s846_s0 = inlined_call_operand.hbm [shape: f32[4], index: 0, kind: input, shape index: {}]   ;;  %s847_s1 = inlined_call_operand.hbm [shape: f32[2,4,256], index: 1, kind: input, shape index: {}]   ;;  %s848_s2 = inlined_call_operand.hbm [shape: f32[2,4,256], index: 2, kind: output, shape index: {}]  }
   0x1   :  { %8 = vsyncpa [#allocation3], 0 }
   0x2   :  { %10 = vsyncpa [#allocation3 + $0x1], 0 }
   0x3   :  { %11 = vsyncpa [#allocation4], 0 }
   0x4   :  { %13 = vsyncpa [#allocation4 + $0x1], 0  ;;  %s616_s9 = smov 0   ;;  %s618_s10 = smov 0  }
   0x5   :  { %s620_s11 = smov 0   ;;  %s622_s12 = smov 0  }
   0x6   :  { %s624_s13 = smov 0   ;;  %s626_s14 = smov 0  }
   0x7 LB: > { %s364_s15 = sadd.s32 4294967295, %s596_s14   ;;  %s365_s16 = sadd.s32 4294967294, %s596_s14   ;;  %s596_s14 = sphi %s626_s14, %s19_s14   ;;  %s592_s13 = sphi %s624_s13, %s872_s13   ;;  %s588_s12 = sphi %s622_s12, %s871_s12   ;;  %s584_s11 = sphi %s620_s11, %s870_s11   ;;  %s580_s10 = sphi %s618_s10, %s869_s10   ;;  %s576_s9 = sphi %s616_s9, %s868_s9  }
   0x8   : > { %p74_p0 = scmp.ne.s32.totalorder %s580_s10, %s576_s9  ;;  %p650_p1 = scmp.eq.s32.totalorder %s364_s15, 0 }
   0x9   : > { %p654_p2 = scmp.eq.s32.totalorder %s364_s15, 1  ;;  %p106_p3 = scmp.eq.s32.totalorder %s365_s16, 1 }
   0xa   : > { %s853_s17 = scalar_select %p650_p1, 1, 0 }
   0xb   : > { %p660_p4 = por %p650_p1, %p74_p0  ;;  %p366_p5 = scmp.ge.s32.totalorder %s596_s14, 1 }
   0xc   : > { %p665_p6 = por %p106_p3, %p74_p0  ;;  %p113_p7 = scmp.lt.s32.totalorder %s596_s14, 3 }
   0xd   : > { %s855_s19 = scalar_select %p660_p4, 1, 0 }
   0xe   : > { %s856_s20 = scalar_select %p665_p6, 1, 0 }
   0xf   : > { %p670_p8 = pnand %p366_p5, %p113_p7  ;;  %s31_s22 = sadd.s32 1, %s592_s13 }
  0x10   : > { %p684_p12 = scmp.ge.s32.totalorder %s31_s22, 2  ;;  %s61_s25 = sadd.s32 1, %s584_s11 }
  0x11   : > { %p398_p10 = pneg %p670_p8  ;;  %p68_p13 = scmp.ne.s32.totalorder %s584_s11, %s580_s10 }
  0x12   : > { %p69_p0 = scmp.eq.s32.totalorder %s596_s14, 0  ;;  %s467_s28 = scalar_lea.hbm %s846_s0, 16 }
  0x13   : > { %p680_p11 = pnand %p398_p10, %p650_p1  ;;  %p468_p3 = scmp.ne.s32.totalorder %s846_s0, %s467_s28 }
  0x14   : > { %p474_p9 = scmp.lt.u32.totalorder %s467_s28, %s846_s0 }
  0x15   : > { %p469_p5 = pneg %p680_p11 }
  0x17   : > { %p470_p7 = pnand %p469_p5, %p468_p3 }
  0x19   : > { %p471_p10 = pneg %p470_p7 }
  0x1b   : > { %p476_p6 = pnand %p474_p9, %p471_p10 }
  0x1d   : > { %479 = shalt.err (!%p476_p6)
}
  0x1e   : > { %s598_s5 = smov [#allocation2]   ;;  %s874_s22 = smov (%p684_p12, %s31_s22), 0 }
  0x1f   : > { %401 = dma.hbm_to_smem (!%p680_p11), %s846_s0, 16, %s598_s5, [#allocation5]  }
  0x20   : > { %p715_p6 = por %p69_p0, %p68_p13  ;;  %p724_p9 = por %p654_p2, %p68_p13 }
  0x21   : > { %s56_s16 = ssub.s32 %s592_s13, %s874_s22  ;;  %p411_p3 = scmp.lt.s32.totalorder %s596_s14, 2 }
  0x22   : > { %s861_s15 = scalar_select %p724_p9, 1, 0 }
  0x23   : > { %p59_p5 = scmp.eq.s32.totalorder %s56_s16, 0  ;;  %s135_s23 = sand.u32 1, %s584_s11  }
  0x24   : > { %s369_s24 = sshll.u32 %s135_s23, 3  ;;  %s388_s27 = sshll.u32 %s592_s13, 7 }
  0x25   : > { %s733_s26 = scalar_select %p59_p5, %s584_s11, %s61_s25  }
  0x26   : > { %s739_s30 = scalar_lea.hbm %s847_s1, %s388_s27  ;;  %s139_s18 = scalar_lea.vmem [#allocation6], %s369_s24 }
  0x27   : > { %s149_s3 = sshll.u32 %s139_s18, 4  ;;  %p745_p2 = pnand %p411_p3, %p715_p6  ;;  %s741_s3 = int_to_ptr.vmem [resolvable:$true] %s149_s3 }
  0x28   : > { %s136_s25 = scalar_lea.sflag [#allocation3], %s135_s23  ;;  %s480_s5 = scalar_lea.hbm %s739_s30, 128 }
  0x29   : > { %p481_p11 = scmp.ne.s32.totalorder %s739_s30, %s480_s5  ;;  %p482_p12 = pneg %p745_p2 }
  0x2a   : > { %s485_s16 = scalar_lea.hbm %s847_s1, 256  ;;  %p486_p7 = scmp.lt.u32.totalorder %s739_s30, %s847_s1 }
  0x2b   : > { %p483_p13 = pnand %p482_p12, %p481_p11  ;;  %p487_p10 = scmp.lt.u32.totalorder %s485_s16, %s480_s5 }
  0x2c   : > { %p489_p3 = scmp.lt.u32.totalorder %s480_s5, %s739_s30 }
  0x2d   : > { %p484_p0 = pneg %p483_p13  ;;  %p488_p6 = por %p487_p10, %p486_p7 }
  0x2f   : > { %p490_p5 = por %p489_p3, %p488_p6 }
  0x31   : > { %p491_p9 = pnand %p490_p5, %p484_p0 }
  0x33   : > { %494 = shalt.err (!%p491_p9)
}
  0x34   : > { %s495_s23 = scalar_lea.vmem %s741_s3, 128  ;;  %s599_s27 = smov [#allocation6]  }
  0x35   : > { %p496_p11 = scmp.ne.s32.totalorder %s741_s3, %s495_s23  ;;  %s500_s28 = sshll.u32 %s599_s27, 4  ;;  %s501_s28 = int_to_ptr.vmem [resolvable:$false] %s500_s28 }
  0x36   : > { %s502_s29 = scalar_lea.vmem %s501_s28, 256  ;;  %p503_p1 = scmp.lt.s32.totalorder %s741_s3, %s501_s28 }
  0x37   : > { %p498_p13 = pnand %p496_p11, %p482_p12  ;;  %p504_p7 = scmp.lt.s32.totalorder %s502_s29, %s495_s23 }
  0x39   : > { %p499_p4 = pneg %p498_p13  ;;  %p505_p10 = por %p504_p7, %p503_p1 }
  0x3b   : > { %p506_p6 = pnand %p505_p10, %p499_p4 }
  0x3d   : > { %509 = shalt.err (!%p506_p6)
}
  0x3e   : > { %405 = dma.hbm_to_vmem [thread:$0]  (!%p745_p2), %s739_s30, 128, %s741_s3, %s136_s25  }
  0x3f   : > { %158 = sbr.rel (%p670_p8) target bundleno = 142 (0x8e), region = 28  ;;  %p863_p9 = scmp.ne.s32.totalorder (!%p670_p8), %s853_s17, 0 }
  0x46   : > { %563 = dma.done.wait (%p863_p9), [#allocation5], 16  }
  0x47   : > { %565 = vsyncadd (%p863_p9), [#allocation5], 4294967280  ;;  %s781_s18 = sand.u32 1, %s580_s10   ;;  %p864_p1 = scmp.ne.s32.totalorder %s855_s19, 0 }
  0x48   : > { %s374_s4 = sshll.u32 %s781_s18, 3  ;;  %s165_s5 = scalar_lea.sflag [#allocation3], %s781_s18 }
  0x49   : > { %s168_s30 = scalar_lea.vmem [#allocation6], %s374_s4 }
  0x4a   : > { %567 = dma.done.wait (%p864_p1), %s165_s5, 128  }
  0x4b   : > { %569 = vsyncadd (%p864_p1), %s165_s5, 4294967168 }
  0x4c   : > { %173 = sfence }
  0x4d   : > { %s193_s21 = sld [smem:[#allocation2]]  ;;  %s376_s17 = sld [smem:[#allocation2 + $0x1]]  ;;  %v192_v0 = vld [vmem:[%s168_s30] sm:$0xff]  ;;  %v227_v18 = vlaneseq }
  0x4e   : > { %s378_s3 = sld [smem:[#allocation2 + $0x2]]  ;;  %s380_s25 = sld [smem:[#allocation2 + $0x3]] }
  0x4f   : > { %v228_v19 = vshrl.u32 %v227_v18, 7  ;;  %s189_s19 = scalar_lea.vmem [#allocation7], %s374_s4  ;;  %s389_s7 = sshll.u32 %s588_s12, 7 }
  0x50   : > { %s268_s6 = sshll.u32 %s189_s19, 4  ;;  %s799_s24 = scalar_lea.hbm %s848_s2, %s389_s7  ;;  %s794_s6 = int_to_ptr.vmem [resolvable:$true] %s268_s6 }
  0x51   : > { %v229_v20 = vsub.s32 0, %v228_v19  ;;  %v233_v21 = vsub.s32 4, %v228_v19  ;;  %s252_s23 = scalar_lea.sflag [#allocation4], %s781_s18  ;;  %s510_s27 = scalar_lea.vmem %s794_s6, 128 }
  0x52   : > { %p511_p4 = scmp.ne.s32.totalorder %s794_s6, %s510_s27  ;;  %p865_p8 = scmp.ne.s32.totalorder %s861_s15, 0 }
  0x53   : > { %v194_v1 = vstv %s193_s21  ;;  %v197_v2 = vstv %s376_s17  ;;  %s600_s12 = smov [#allocation7]  }
  0x54   : > { %v205_v3 = vstv %s378_s3  ;;  %v195_v4 = vmul.f32 %v194_v1, %v192_v0  ;;  %v198_v5 = vmul.f32 %v197_v2, %v192_v0  ;;  %v213_v7 = vstv %s380_s25  ;;  %p512_p2 = pnand %p511_p4, %p865_p8  ;;  %s514_s28 = sshll.u32 %s600_s12, 4  ;;  %s515_s28 = int_to_ptr.vmem [resolvable:$false] %s514_s28 }
  0x55   : > { %v206_v6 = vmul.f32 %v205_v3, %v192_v0  ;;  %v214_v8 = vmul.f32 %v213_v7, %v192_v0  ;;  %s516_s29 = scalar_lea.vmem %s515_s28, 256  ;;  %p517_p0 = scmp.lt.s32.totalorder %s794_s6, %s515_s28 }
  0x56   : > { %v377_v9 = vrot.slane %v198_v5, 9  ;;  %p513_p12 = pneg %p512_p2  ;;  %p518_p3 = scmp.lt.s32.totalorder %s516_s29, %s510_s27 }
  0x57   : > { %v379_v10 = vrot.slane %v206_v6, 10  ;;  %v381_v12 = vrot.slane %v214_v8, 11 }
  0x58   : > { %v203_v11 = vadd.f32 %v377_v9, %v195_v4  ;;  %p519_p5 = por %p518_p3, %p517_p0 }
  0x5a   : > { %v211_v13 = vadd.f32 %v379_v10, %v203_v11  ;;  %p520_p11 = pnand %p519_p5, %p513_p12 }
  0x5c   : > { %v219_v14 = vadd.f32 %v381_v12, %v211_v13 }
  0x5e   : > { %v382_v15 = vmul.f32 -1.442695, %v219_v14 }
  0x60   : > { %463 = vpow2.f32 %v382_v15 }
  0x6a   : > { %v464_v16 = vpop.eup %463 }
  0x6b   : > { %v223_v17 = vadd.f32 1.0, %v464_v16 }
  0x6d   : > { %465 = vrcp.f32 %v223_v17 }
  0x77   : > { %v466_v22 = vpop.eup %465 }
  0x78   : > { %v230_v23 = vrot.slane %v466_v22, %v229_v20  ;;  %v234_v24 = vrot.slane %v466_v22, %v233_v21 }
  0x7a   : > { %v240_v25 = vrot.slane %v230_v23, %v229_v20  ;;  %v244_v26 = vrot.slane %v234_v24, %v229_v20 }
  0x7c   : > { %v247_v27 = vcombine.low %v240_v25, %v244_v26 }
  0x7e   : > { %v249_v28 = vmul.f32 %v247_v27, %v192_v0 }
  0x80   : > { %250 = vst [vmem:[%s189_s19] sm:$0xff] %v249_v28 }
  0x81   : > { %523 = shalt.err (!%p520_p11)
}
  0x82   : > { %s524_s18 = scalar_lea.hbm %s799_s24, 128  ;;  %s528_s30 = scalar_lea.hbm %s848_s2, 256 }
  0x83   : > { %p525_p13 = scmp.ne.s32.totalorder %s799_s24, %s524_s18  ;;  %p529_p6 = scmp.lt.u32.totalorder %s799_s24, %s848_s2 }
  0x84   : > { %p530_p9 = scmp.lt.u32.totalorder %s528_s30, %s524_s18  ;;  %p532_p4 = scmp.lt.u32.totalorder %s524_s18, %s799_s24 }
  0x85   : > { %p526_p7 = pnand %p525_p13, %p865_p8 }
  0x86   : > { %p531_p1 = por %p530_p9, %p529_p6 }
  0x87   : > { %p527_p10 = pneg %p526_p7 }
  0x88   : > { %p533_p2 = por %p532_p4, %p531_p1 }
  0x8a   : > { %p534_p12 = pnand %p533_p2, %p527_p10 }
  0x8c   : > { %537 = shalt.err (!%p534_p12)
}
  0x8d   : > { %396 = dma.vmem_to_hbm [thread:$0]  (%p865_p8), %s794_s6, 128, %s799_s24, %s252_s23  }
  0x8e PF: > { %s280_s3 = sand.u32 1, %s576_s9   ;;  %p866_p0 = scmp.ne.s32.totalorder %s856_s20, 0 }
  0x8f   : > { %p867_p3 = scmp.ge.s32.totalorder %s596_s14, 2  ;;  %s281_s25 = scalar_lea.sflag [#allocation4], %s280_s3 }
  0x91   : > { %p407_p5 = pnand %p867_p3, %p866_p0 }
  0x93   : > { %571 = dma.done.wait (!%p407_p5), %s281_s25, 128  }
  0x94   : > { %573 = vsyncadd (!%p407_p5), %s281_s25, 4294967168  ;;  %s19_s14 = sadd.s32 1, %s596_s14   ;;  %s868_s9 = smov %s580_s10 }
  0x95   : > { %p16_p11 = scmp.ge.s32.totalorder %s19_s14, 4   ;;  %s869_s10 = smov %s584_s11 }
  0x96   : > { %s870_s11 = smov %s733_s26  ;;  %s871_s12 = smov %s592_s13 }
  0x97   : > { %s872_s13 = smov %s874_s22  ;;  %18 = sbr.rel (!%p16_p11) target bundleno = 7 (0x7), region = 78 }
  0x9e   :  { %286 = vsyncpa [#allocation3], 1 }
  0x9f   :  { %288 = vsyncpa [#allocation3 + $0x1], 1 }
  0xa0   :  { %289 = vsyncpa [#allocation4], 1 }
  0xa1   :  { %291 = vsyncpa [#allocation4 + $0x1], 1 }
  0xa2   :  { %292 = vsyncpa [#allocation5], 1 }
  0xa3   :  { %294 = vsyncpa [#allocation5 + $0x1], 1 }

</bundles_post_ra>
